<compile_context>
chip_gen: v7x
topology: tpu7x:2x2x1
jax: 0.10.0
libtpu: 0.0.40
codegen_flags: <defaults>
</compile_context>

<pallas_src>
import jax
import jax.numpy as jnp
from jax.experimental import pallas as pl
from jax.experimental.pallas import tpu as pltpu

HIDDEN1 = 256
HIDDEN2 = 128
LANE = 128      # lane width (last-dim tiling unit)
SUBLANE = 8     # sublane width (second-to-last-dim tiling unit)


def _round_up(x, m):
    return (x + m - 1) // m * m


def mlp_kernel(x_ref, w1_ref, b1_ref, w2_ref, b2_ref, w3_ref, b3_ref, o_ref):
    # y = relu(relu(x @ W1 + b1) @ W2 + b2) @ W3 + b3  on one batch tile.
    # Matmul operands may be bf16 (the wrapper decides); accumulation is f32
    # via preferred_element_type, bias-add / ReLU are done in f32.
    x = x_ref[...]
    h1 = jnp.dot(x, w1_ref[...], preferred_element_type=jnp.float32) + b1_ref[...]
    h1 = jnp.maximum(h1, 0.0)
    h2 = jnp.dot(h1.astype(w2_ref.dtype), w2_ref[...],
                 preferred_element_type=jnp.float32) + b2_ref[...]
    h2 = jnp.maximum(h2, 0.0)
    out = jnp.dot(h2.astype(w3_ref.dtype), w3_ref[...],
                  preferred_element_type=jnp.float32) + b3_ref[...]
    o_ref[...] = out.astype(o_ref.dtype)


def mlp_forward(x, params, *, batch_tile=256, use_bf16_matmul=True):
    """x: [B, input_dim] float32. params: dict of w1,b1,w2,b2,w3,b3 (f32)."""
    B, D = x.shape
    w1, b1 = params["w1"], params["b1"]   # [D, 256],   [1, 256]
    w2, b2 = params["w2"], params["b2"]   # [256, 128], [1, 128]
    w3, b3 = params["w3"], params["b3"]   # [128, C],   [1, C]
    num_classes = w3.shape[1]

    # --- Lane-dense output: pad class dim up to a multiple of 128. ---
    n_pad = _round_up(num_classes, LANE)
    if n_pad != num_classes:
        w3 = jnp.pad(w3, ((0, 0), (0, n_pad - num_classes)))
        b3 = jnp.pad(b3, ((0, 0), (0, n_pad - num_classes)))

    # --- Batch tiling: one grid step for small batches, big tiles otherwise. ---
    batch_tile = max(SUBLANE, _round_up(batch_tile, SUBLANE))
    b_pad = _round_up(B, SUBLANE)
    if b_pad <= batch_tile:
        tile_b = b_pad                       # whole batch in a single grid step
    else:
        tile_b = batch_tile
        b_pad = _round_up(B, tile_b)
    if b_pad != B:
        x = jnp.pad(x, ((0, b_pad - B), (0, 0)))
    grid = (b_pad // tile_b,)

    # --- bf16 MXU operands (f32 accumulation / elementwise stay in-kernel). ---
    if use_bf16_matmul:
        x = x.astype(jnp.bfloat16)
        w1 = w1.astype(jnp.bfloat16)
        w2 = w2.astype(jnp.bfloat16)
        w3 = w3.astype(jnp.bfloat16)

    full = lambda i: (0, 0)  # weights/biases: same (only) block every grid step
    # NOTE: constant-index weight blocks are still double-buffered by default
    # (~2x a few hundred KB here — negligible). If input_dim grows large enough
    # to pressure v7x's 64 MiB VMEM, add pipeline_mode=pl.Buffered(1) to them.

    in_specs = [
        pl.BlockSpec((tile_b, D), lambda i: (i, 0)),   # x tile
        pl.BlockSpec((D, HIDDEN1), full),
        pl.BlockSpec((1, HIDDEN1), full),
        pl.BlockSpec((HIDDEN1, HIDDEN2), full),
        pl.BlockSpec((1, HIDDEN2), full),
        pl.BlockSpec((HIDDEN2, n_pad), full),
        pl.BlockSpec((1, n_pad), full),
    ]

    # --- Cost estimate for XLA's scheduler. ---
    flops = 2 * b_pad * (D * HIDDEN1 + HIDDEN1 * HIDDEN2 + HIDDEN2 * n_pad)
    bytes_accessed = (
        x.size * x.dtype.itemsize
        + sum(a.size * a.dtype.itemsize for a in (w1, b1, w2, b2, w3, b3))
        + b_pad * n_pad * 4
    )
    cost = pl.CostEstimate(flops=flops, transcendentals=0,
                           bytes_accessed=bytes_accessed)

    # --- Explicit VMEM budget (v7x: 64 MiB physical / 32 MiB scoped default). ---
    w_bytes = sum(a.size * a.dtype.itemsize for a in (w1, b1, w2, b2, w3, b3))
    vmem_est = (2 * tile_b * D * x.dtype.itemsize      # x tile, double-buffered
                + 2 * tile_b * n_pad * 4               # out tile, double-buffered
                + 2 * w_bytes                          # weights, double-buffered
                + tile_b * (HIDDEN1 + HIDDEN2) * 6)    # h1/h2 f32 + bf16 copies
    vmem_limit = int(min(max(2 * vmem_est, 16 << 20), 64 << 20))

    out = pl.pallas_call(
        mlp_kernel,
        out_shape=jax.ShapeDtypeStruct((b_pad, n_pad), jnp.float32),
        grid_spec=pltpu.PrefetchScalarGridSpec(
            num_scalar_prefetch=0,
            grid=grid,
            in_specs=in_specs,
            out_specs=pl.BlockSpec((tile_b, n_pad), lambda i: (i, 0)),
        ),
        compiler_params=pltpu.CompilerParams(
            dimension_semantics=("parallel",),   # megacore-shardable on v7x
            vmem_limit_bytes=vmem_limit,
        ),
        cost_estimate=cost,
    )(x, w1, b1, w2, b2, w3, b3)

    # Strip batch padding and the lane padding on the class dim.
    return out[:B, :num_classes]


def init_params(key, input_dim, num_classes):
    """Deterministic init mimicking nn.Linear's U(-1/sqrt(fan_in), 1/sqrt(fan_in))."""
    ks = jax.random.split(key, 6)

    def linear(kw, kb, fan_in, fan_out):
        bound = 1.0 / jnp.sqrt(fan_in)
        w = jax.random.uniform(kw, (fan_in, fan_out), jnp.float32, -bound, bound)
        b = jax.random.uniform(kb, (1, fan_out), jnp.float32, -bound, bound)
        return w, b

    w1, b1 = linear(ks[0], ks[1], input_dim, HIDDEN1)
    w2, b2 = linear(ks[2], ks[3], HIDDEN1, HIDDEN2)
    w3, b3 = linear(ks[4], ks[5], HIDDEN2, num_classes)
    return {"w1": w1, "b1": b1, "w2": w2, "b2": b2, "w3": w3, "b3": b3}


def mlp_reference(x, p, operand_dtype=jnp.float32):
    """Pure-JAX reference; operand_dtype mirrors the kernel's MXU operand cast."""
    cast = lambda a: a.astype(operand_dtype)
    h1 = jnp.maximum(jnp.dot(cast(x), cast(p["w1"]),
                             preferred_element_type=jnp.float32) + p["b1"], 0.0)
    h2 = jnp.maximum(jnp.dot(cast(h1), cast(p["w2"]),
                             preferred_element_type=jnp.float32) + p["b2"], 0.0)
    return jnp.dot(cast(h2), cast(p["w3"]),
                   preferred_element_type=jnp.float32) + p["b3"]


if __name__ == "__main__":
    key = jax.random.PRNGKey(0)
    k_x, k_p, k_x2 = jax.random.split(key, 3)

    batch, input_dim, num_classes = 16, 64, 10
    x = jax.random.normal(k_x, (batch, input_dim), jnp.float32)
    params = init_params(k_p, input_dim, num_classes)

    # Small batch: whole batch in one grid step (grid=(1,)).
    out = mlp_forward(x, params)
    out = jax.block_until_ready(out)
    assert out.shape == (batch, num_classes)

    ref_bf16 = mlp_reference(x, params, jnp.bfloat16)   # mirrors kernel math
    ref_f32 = mlp_reference(x, params, jnp.float32)     # exact module semantics
    assert jnp.allclose(out, ref_bf16, atol=2e-3, rtol=2e-3), "mismatch vs bf16 ref"
    assert jnp.allclose(out, ref_f32, atol=5e-2, rtol=5e-2), "mismatch vs f32 ref"

    # Also exercise the tiled (grid > 1) + batch-padding path.
    batch2 = 300
    x2 = jax.random.normal(k_x2, (batch2, input_dim), jnp.float32)
    out2 = jax.block_until_ready(mlp_forward(x2, params, batch_tile=128))
    assert out2.shape == (batch2, num_classes)
    ref2 = mlp_reference(x2, params, jnp.bfloat16)
    assert jnp.allclose(out2, ref2, atol=2e-3, rtol=2e-3), "mismatch (tiled path)"

    print("KERNEL_OK")
</pallas_src>

<mosaic_0001>
module attributes {stable_mosaic.version = 11 : i64} {
  func.func @mlp_kernel(%arg0: i32, %arg1: memref<16x64xbf16, #tpu.memory_space<vmem>>, %arg2: memref<64x256xbf16, #tpu.memory_space<vmem>>, %arg3: memref<1x256xf32, #tpu.memory_space<vmem>>, %arg4: memref<256x128xbf16, #tpu.memory_space<vmem>>, %arg5: memref<1x128xf32, #tpu.memory_space<vmem>>, %arg6: memref<128x128xbf16, #tpu.memory_space<vmem>>, %arg7: memref<1x128xf32, #tpu.memory_space<vmem>>, %arg8: memref<16x128xf32, #tpu.memory_space<vmem>>) attributes {dimension_semantics = [#tpu.dimension_semantics<parallel>], iteration_bounds = array<i64: 1>, scalar_prefetch = 0 : i64, scratch_operands = 0 : i64, tpu.core_type = #tpu.core_type<tc>, window_params = [{transform_indices = @transform_0, window_bounds = array<i64: 16, 64>}, {pipeline_mode = #tpu.pipeline_mode<synchronous>, transform_indices = @transform_1, window_bounds = array<i64: 64, 256>}, {pipeline_mode = #tpu.pipeline_mode<synchronous>, transform_indices = @transform_2, window_bounds = array<i64: 1, 256>}, {pipeline_mode = #tpu.pipeline_mode<synchronous>, transform_indices = @transform_3, window_bounds = array<i64: 256, 128>}, {pipeline_mode = #tpu.pipeline_mode<synchronous>, transform_indices = @transform_4, window_bounds = array<i64: 1, 128>}, {pipeline_mode = #tpu.pipeline_mode<synchronous>, transform_indices = @transform_5, window_bounds = array<i64: 128, 128>}, {pipeline_mode = #tpu.pipeline_mode<synchronous>, transform_indices = @transform_6, window_bounds = array<i64: 1, 128>}, {transform_indices = @transform_7, window_bounds = array<i64: 16, 128>}]} {
    %c0 = arith.constant 0 : index
    %c0_0 = arith.constant 0 : index
    %0 = vector.load %arg1[%c0, %c0_0] : memref<16x64xbf16, #tpu.memory_space<vmem>>, vector<16x64xbf16>
    %c0_1 = arith.constant 0 : index
    %c0_2 = arith.constant 0 : index
    %1 = vector.load %arg2[%c0_1, %c0_2] : memref<64x256xbf16, #tpu.memory_space<vmem>>, vector<64x256xbf16>
    %cst = arith.constant dense<0.000000e+00> : vector<16x256xf32>
    %2 = tpu.matmul %0, %1, %cst {dimension_numbers = #tpu.dot_dimension_numbers<[1], [0], [0], [1], [0, 0, 1, 1], [], []>} : vector<16x64xbf16>, vector<64x256xbf16>, vector<16x256xf32> -> vector<16x256xf32>
    %c0_3 = arith.constant 0 : index
    %c0_4 = arith.constant 0 : index
    %3 = vector.load %arg3[%c0_3, %c0_4] : memref<1x256xf32, #tpu.memory_space<vmem>>, vector<1x256xf32>
    %4 = vector.broadcast %3 : vector<1x256xf32> to vector<16x256xf32>
    %5 = arith.addf %2, %4 : vector<16x256xf32>
    %cst_5 = arith.constant 0.000000e+00 : f32
    %6 = vector.broadcast %cst_5 : f32 to vector<16x256xf32>
    %7 = arith.maximumf %5, %6 : vector<16x256xf32>
    %8 = arith.truncf %7 : vector<16x256xf32> to vector<16x256xbf16>
    %c0_6 = arith.constant 0 : index
    %c0_7 = arith.constant 0 : index
    %9 = vector.load %arg4[%c0_6, %c0_7] : memref<256x128xbf16, #tpu.memory_space<vmem>>, vector<256x128xbf16>
    %cst_8 = arith.constant dense<0.000000e+00> : vector<16x128xf32>
    %10 = tpu.matmul %8, %9, %cst_8 {dimension_numbers = #tpu.dot_dimension_numbers<[1], [0], [0], [1], [0, 0, 1, 1], [], []>} : vector<16x256xbf16>, vector<256x128xbf16>, vector<16x128xf32> -> vector<16x128xf32>
    %c0_9 = arith.constant 0 : index
    %c0_10 = arith.constant 0 : index
    %11 = vector.load %arg5[%c0_9, %c0_10] : memref<1x128xf32, #tpu.memory_space<vmem>>, vector<1x128xf32>
    %12 = vector.broadcast %11 : vector<1x128xf32> to vector<16x128xf32>
    %13 = arith.addf %10, %12 : vector<16x128xf32>
    %cst_11 = arith.constant 0.000000e+00 : f32
    %14 = vector.broadcast %cst_11 : f32 to vector<16x128xf32>
    %15 = arith.maximumf %13, %14 : vector<16x128xf32>
    %16 = arith.truncf %15 : vector<16x128xf32> to vector<16x128xbf16>
    %c0_12 = arith.constant 0 : index
    %c0_13 = arith.constant 0 : index
    %17 = vector.load %arg6[%c0_12, %c0_13] : memref<128x128xbf16, #tpu.memory_space<vmem>>, vector<128x128xbf16>
    %cst_14 = arith.constant dense<0.000000e+00> : vector<16x128xf32>
    %18 = tpu.matmul %16, %17, %cst_14 {dimension_numbers = #tpu.dot_dimension_numbers<[1], [0], [0], [1], [0, 0, 1, 1], [], []>} : vector<16x128xbf16>, vector<128x128xbf16>, vector<16x128xf32> -> vector<16x128xf32>
    %c0_15 = arith.constant 0 : index
    %c0_16 = arith.constant 0 : index
    %19 = vector.load %arg7[%c0_15, %c0_16] : memref<1x128xf32, #tpu.memory_space<vmem>>, vector<1x128xf32>
    %20 = vector.broadcast %19 : vector<1x128xf32> to vector<16x128xf32>
    %21 = arith.addf %18, %20 : vector<16x128xf32>
    %c0_17 = arith.constant 0 : index
    %c0_18 = arith.constant 0 : index
    %22 = vector.load %arg8[%c0_17, %c0_18] : memref<16x128xf32, #tpu.memory_space<vmem>>, vector<16x128xf32>
    tpu.vector_store %arg8[%c0_17, %c0_18], %21 {strides = array<i32>} : memref<16x128xf32, #tpu.memory_space<vmem>>, vector<16x128xf32>,
    return
  }
  func.func @transform_0(%arg0: i32) -> (i32, i32) {
    %c0_i32 = arith.constant 0 : i32
    %c0_i32_0 = arith.constant 0 : i32
    return %arg0, %c0_i32 : i32, i32
  }
  func.func @transform_1(%arg0: i32) -> (i32, i32) {
    %c0_i32 = arith.constant 0 : i32
    %c0_i32_0 = arith.constant 0 : i32
    %c0_i32_1 = arith.constant 0 : i32
    return %c0_i32, %c0_i32_0 : i32, i32
  }
  func.func @transform_2(%arg0: i32) -> (i32, i32) {
    %c0_i32 = arith.constant 0 : i32
    %c0_i32_0 = arith.constant 0 : i32
    %c0_i32_1 = arith.constant 0 : i32
    return %c0_i32, %c0_i32_0 : i32, i32
  }
  func.func @transform_3(%arg0: i32) -> (i32, i32) {
    %c0_i32 = arith.constant 0 : i32
    %c0_i32_0 = arith.constant 0 : i32
    %c0_i32_1 = arith.constant 0 : i32
    return %c0_i32, %c0_i32_0 : i32, i32
  }
  func.func @transform_4(%arg0: i32) -> (i32, i32) {
    %c0_i32 = arith.constant 0 : i32
    %c0_i32_0 = arith.constant 0 : i32
    %c0_i32_1 = arith.constant 0 : i32
    return %c0_i32, %c0_i32_0 : i32, i32
  }
  func.func @transform_5(%arg0: i32) -> (i32, i32) {
    %c0_i32 = arith.constant 0 : i32
    %c0_i32_0 = arith.constant 0 : i32
    %c0_i32_1 = arith.constant 0 : i32
    return %c0_i32, %c0_i32_0 : i32, i32
  }
  func.func @transform_6(%arg0: i32) -> (i32, i32) {
    %c0_i32 = arith.constant 0 : i32
    %c0_i32_0 = arith.constant 0 : i32
    %c0_i32_1 = arith.constant 0 : i32
    return %c0_i32, %c0_i32_0 : i32, i32
  }
  func.func @transform_7(%arg0: i32) -> (i32, i32) {
    %c0_i32 = arith.constant 0 : i32
    %c0_i32_0 = arith.constant 0 : i32
    return %arg0, %c0_i32 : i32, i32
  }
}

</mosaic_0001>

<bundles_post_ra>
// kernel: tpu_custom_call.1
= control target key start
LH: loop header
LB: loop body
LE: loop exit
PB: predicated region body
PF: predicated region fallthrough
CT: control target
= control target key end

     0   :  { %12 = vsyncpa [#allocation3], 0  ;;  %s912_s0 = inlined_call_operand.hbm [shape: bf16[16,64], index: 0, kind: input, shape index: {}]   ;;  %s913_s1 = inlined_call_operand.hbm [shape: bf16[64,256], index: 1, kind: input, shape index: {}]   ;;  %s914_s2 = inlined_call_operand.vmem [shape: f32[1,256], index: 2, kind: input, shape index: {}]   ;;  %s915_s3 = inlined_call_operand.hbm [shape: bf16[256,128], index: 3, kind: input, shape index: {}]   ;;  %s916_s4 = inlined_call_operand.vmem [shape: f32[1,128], index: 4, kind: input, shape index: {}]   ;;  %s917_s5 = inlined_call_operand.hbm [shape: bf16[128,128], index: 5, kind: input, shape index: {}]   ;;  %s918_s6 = inlined_call_operand.vmem [shape: f32[1,128], index: 6, kind: input, shape index: {}]   ;;  %s919_s7 = inlined_call_operand.hbm [shape: f32[16,128], index: 7, kind: output, shape index: {}]  }
   0x1   :  { %13 = vsyncpa [#allocation6], 0 }
   0x2   :  { %14 = vsyncpa [#allocation9], 0 }
   0x3   :  { %15 = vsyncpa [#allocation4], 0  ;;  %s769_s24 = smov [#allocation5]   ;;  %s651_s28 = scalar_lea.hbm %s913_s1, 1024 }
   0x4   :  { %s33_s25 = sshll.u32 %s769_s24, 4  ;;  %p652_p0 = scmp.ne.s32.totalorder %s913_s1, %s651_s28  ;;  %s34_s25 = int_to_ptr.vmem [resolvable:$true] %s33_s25 }
   0x5   :  { %p655_p1 = scmp.lt.u32.totalorder %s651_s28, %s913_s1 }
   0x7   :  { %p657_p2 = pnand %p655_p1, %p652_p0 }
   0x9   :  { %660 = shalt.err (!%p657_p2)
}
   0xa   :  { %s661_s10 = scalar_lea.vmem %s34_s25, 1024  ;;  %p666_p4 = scmp.lt.s32.totalorder %s34_s25, %s34_s25 }
   0xb   :  { %p662_p3 = scmp.ne.s32.totalorder %s34_s25, %s661_s10  ;;  %p667_p5 = scmp.lt.s32.totalorder %s661_s10, %s661_s10 }
   0xd   :  { %p668_p6 = por %p667_p5, %p666_p4 }
   0xf   :  { %p669_p7 = pnand %p668_p6, %p662_p3 }
  0x11   :  { %672 = shalt.err (!%p669_p7)
}
  0x12   :  { %s770_s11 = smov 128   ;;  %s771_s12 = smov 8  }
  0x13   :  { %39 = dma.hbm_to_vmem [thread:$0]  %s913_s1, 1024, %s34_s25, [#allocation6], %s770_s11, %s770_s11, %s771_s12  }
  0x14   :  { %s772_s15 = smov [#allocation2]   ;;  %s673_s19 = scalar_lea.hbm %s912_s0, 128 }
  0x15   :  { %s21_s16 = sshll.u32 %s772_s15, 4  ;;  %p674_p8 = scmp.ne.s32.totalorder %s912_s0, %s673_s19  ;;  %s22_s16 = int_to_ptr.vmem [resolvable:$true] %s21_s16 }
  0x16   :  { %p677_p9 = scmp.lt.u32.totalorder %s673_s19, %s912_s0 }
  0x18   :  { %p679_p10 = pnand %p677_p9, %p674_p8 }
  0x1a   :  { %682 = shalt.err (!%p679_p10)
}
  0x1b   :  { %s683_s24 = scalar_lea.vmem %s22_s16, 128  ;;  %p688_p12 = scmp.lt.s32.totalorder %s22_s16, %s22_s16 }
  0x1c   :  { %p684_p11 = scmp.ne.s32.totalorder %s22_s16, %s683_s24  ;;  %p689_p13 = scmp.lt.s32.totalorder %s683_s24, %s683_s24 }
  0x1e   :  { %p690_p0 = por %p689_p13, %p688_p12 }
  0x20   :  { %p691_p1 = pnand %p690_p0, %p684_p11 }
  0x22   :  { %694 = shalt.err (!%p691_p1)
}
  0x23   :  { %s773_s1 = smov 64   ;;  %s774_s25 = smov 4  }
  0x24   :  { %27 = dma.hbm_to_vmem [thread:$0]  %s912_s0, 128, %s22_s16, [#allocation3], %s773_s1, %s773_s1, %s774_s25  }
  0x25   :  { %s775_s28 = smov [#allocation7]   ;;  %s776_s30 = smov [#allocation8]  }
  0x26   :  { %s47_s29 = sshll.u32 %s775_s28, 4  ;;  %s61_s8 = sshll.u32 %s776_s30, 4  ;;  %s48_s29 = int_to_ptr.vmem [resolvable:$true] %s47_s29  ;;  %s851_s8 = int_to_ptr.vmem [resolvable:$true] %s61_s8 }
  0x27   :  { %s695_s13 = scalar_lea.hbm %s915_s3, 2048 }
  0x28   :  { %p696_p2 = scmp.ne.s32.totalorder %s915_s3, %s695_s13  ;;  %p699_p3 = scmp.lt.u32.totalorder %s695_s13, %s915_s3 }
  0x2a   :  { %p701_p4 = pnand %p699_p3, %p696_p2 }
  0x2c   :  { %704 = shalt.err (!%p701_p4)
}
  0x2d   :  { %s705_s0 = scalar_lea.vmem %s48_s29, 2048  ;;  %p710_p6 = scmp.lt.s32.totalorder %s48_s29, %s48_s29 }
  0x2e   :  { %p706_p5 = scmp.ne.s32.totalorder %s48_s29, %s705_s0  ;;  %p711_p7 = scmp.lt.s32.totalorder %s705_s0, %s705_s0 }
  0x30   :  { %p712_p8 = por %p711_p7, %p710_p6 }
  0x32   :  { %p713_p9 = pnand %p712_p8, %p706_p5 }
  0x34   :  { %716 = shalt.err (!%p713_p9)
}
  0x35   :  { %53 = dma.hbm_to_vmem [thread:$0]  %s915_s3, 2048, %s48_s29, [#allocation6], %s773_s1, %s773_s1, %s774_s25  }
  0x36   :  { %s717_s22 = scalar_lea.hbm %s917_s5, 1024 }
  0x37   :  { %p718_p10 = scmp.ne.s32.totalorder %s917_s5, %s717_s22  ;;  %p721_p11 = scmp.lt.u32.totalorder %s717_s22, %s917_s5 }
  0x39   :  { %p723_p12 = pnand %p721_p11, %p718_p10 }
  0x3b   :  { %726 = shalt.err (!%p723_p12)
}
  0x3c   :  { %s727_s28 = scalar_lea.vmem %s851_s8, 1024  ;;  %p732_p0 = scmp.lt.s32.totalorder %s851_s8, %s851_s8 }
  0x3d   :  { %p728_p13 = scmp.ne.s32.totalorder %s851_s8, %s727_s28  ;;  %p733_p1 = scmp.lt.s32.totalorder %s727_s28, %s727_s28 }
  0x3f   :  { %p734_p2 = por %p733_p1, %p732_p0 }
  0x41   :  { %p735_p3 = pnand %p734_p2, %p728_p13 }
  0x43   :  { %738 = shalt.err (!%p735_p3)
}
  0x44   :  { %67 = dma.hbm_to_vmem [thread:$0]  %s917_s5, 1024, %s851_s8, [#allocation9], %s773_s1, %s773_s1, %s774_s25  }
  0x45   :  { %761 = dma.done.wait [#allocation3], 128  }
  0x46   :  { %762 = vsyncadd [#allocation3], 4294967168 }
  0x47   :  { %763 = dma.done.wait [#allocation6], 3072  }
  0x48   :  { %764 = vsyncadd [#allocation6], 4294964224 }
  0x49   :  { %765 = dma.done.wait [#allocation9], 1024  }
  0x4a   :  { %766 = vsyncadd [#allocation9], 4294966272  ;;  %v777_v0 = vmov 0   ;;  %v614_v1 = vld [vmem:[#allocation5 + $0x4] ss:$8 sps:$4 sm:$0xff]   ;;  %v631_v13 = vld [vmem:[#allocation7 + $0x50] sm:$0xff]   ;;  %v95_v32 = vlaneseq }
  0x4b   :  { %186 = vmatprep.mubr.bf16.mxu0 %v777_v0  ;;  %v616_v2 = vld [vmem:[#allocation5] ss:$8 sps:$4 sm:$0xff]   ;;  %154 = vmatprep.subr.bf16.mxu0 %v614_v1  ;;  %v617_v3 = vld [vmem:[#allocation5 + $0x14] ss:$8 sps:$4 sm:$0xff]   ;;  %v619_v4 = vld [vmem:[#allocation5 + $0x10] ss:$8 sps:$4 sm:$0xff]  }
  0x4c   :  { %155 = vmatpush1.bf16.msra.mxu0 %v616_v2  ;;  %v620_v5 = vld [vmem:[#allocation5 + $0x24] ss:$8 sps:$4 sm:$0xff]   ;;  %v622_v6 = vld [vmem:[#allocation5 + $0x20] ss:$8 sps:$4 sm:$0xff]   ;;  %v623_v7 = vld [vmem:[#allocation5 + $0x34] ss:$8 sps:$4 sm:$0xff]  }
  0x4d   :  { %156 = vmatprep.subr.bf16.mxu0 %v617_v3  ;;  %v627_v8 = vld [vmem:[#allocation7 + $0x40] sm:$0xff]   ;;  %v625_v10 = vld [vmem:[#allocation5 + $0x30] ss:$8 sps:$4 sm:$0xff]   ;;  %v629_v11 = vld [vmem:[#allocation7 + $0x48] sm:$0xff]   ;;  %vm150_vm0 = vcmask 523264   ;;  %v778_v27 = vmov 0.0  }
  0x4e   :  { %v628_v9 = vld [vmem:[#allocation7] sm:$0xff]   ;;  %551 = vmatprep.subr.bf16.mxu1 %v627_v8  ;;  %v630_v12 = vld [vmem:[#allocation7 + $0x8] sm:$0xff]   ;;  %v626_v14 = vld [vmem:[#allocation2] sm:$0xff]   ;;  %v96_v33 = vshrl.u32 %v95_v32, 7  ;;  %vm779_vm1 = vmmov 0   ;;  %s780_s9 = smov [#allocation10]  }
  0x4f   :  { %552 = vmatpush3.bf16.msra.mxu1 %v628_v9  ;;  %v632_v15 = vld [vmem:[#allocation7 + $0x10] sm:$0xff]   ;;  %v633_v16 = vld [vmem:[#allocation7 + $0x58] sm:$0xff]   ;;  %v635_v18 = vld [vmem:[#allocation7 + $0x60] sm:$0xff]   ;;  %s501_s10 = sshll.u32 %s780_s9, 4  ;;  %s502_s10 = int_to_ptr.vmem [resolvable:$true] %s501_s10 }
  0x50   :  { %157 = vmatpush1.bf16.msra.mxu0 %v619_v4  ;;  %553 = vmatprep.subr.bf16.mxu1 %v629_v11  ;;  %v634_v17 = vld [vmem:[#allocation7 + $0x18] sm:$0xff]   ;;  %v636_v19 = vld [vmem:[#allocation7 + $0x20] sm:$0xff]   ;;  %v637_v20 = vld [vmem:[#allocation7 + $0x68] sm:$0xff]   ;;  %v97_v34 = vsub.s32 0, %v96_v33  ;;  %v101_v36 = vsub.s32 1, %v96_v33  ;;  %p744_p5 = scmp.lt.s32.totalorder %s502_s10, %s502_s10 }
  0x51   :  { %158 = vmatprep.subr.bf16.mxu0 %v620_v5  ;;  %v638_v21 = vld [vmem:[#allocation7 + $0x28] sm:$0xff]   ;;  %v639_v22 = vld [vmem:[#allocation7 + $0x70] sm:$0xff]   ;;  %v641_v24 = vld [vmem:[#allocation7 + $0x78] sm:$0xff]  }
  0x52   :  { %v640_v23 = vld [vmem:[#allocation7 + $0x30] sm:$0xff]   ;;  %v642_v25 = vld [vmem:[#allocation7 + $0x38] sm:$0xff]   ;;  %v643_v26 = vld [vmem:[#allocation8] sm:$0xff]  }
  0x53   :  { %554 = vmatpush3.bf16.msra.mxu1 %v630_v12  ;;  %v644_v28 = vld [vmem:[#allocation8 + $0x8] sm:$0xff]   ;;  %v645_v29 = vld [vmem:[#allocation8 + $0x10] sm:$0xff]   ;;  %v646_v30 = vld [vmem:[#allocation8 + $0x18] sm:$0xff]  }
  0x54   :  { %159 = vmatpush1.bf16.msra.mxu0 %v622_v6  ;;  %555 = vmatprep.subr.bf16.mxu1 %v631_v13  ;;  %v647_v31 = vld [vmem:[#allocation8 + $0x20] sm:$0xff]   ;;  %v93_v35 = vld [vmem:[%s914_s2] sm:$0x3]  ;;  %v648_v53 = vld [vmem:[#allocation8 + $0x28] sm:$0xff]  }
  0x55   :  { %160 = vmatprep.subr.bf16.mxu0 %v623_v7  ;;  %v98_v37 = vrot.slane %v93_v35, %v97_v34  ;;  %v102_v38 = vrot.slane %v93_v35, %v101_v36  ;;  %v649_v54 = vld [vmem:[#allocation8 + $0x30] sm:$0xff]   ;;  %v650_v55 = vld [vmem:[#allocation8 + $0x38] sm:$0xff]  }
  0x56   :  { %v525_v57 = vld [vmem:[%s916_s4] ss:$0 sm:$0xff]  ;;  %s739_s4 = scalar_lea.vmem %s502_s10, 256 }
  0x57   :  { %556 = vmatpush3.bf16.msra.mxu1 %v632_v15  ;;  %v542_v4 = vld [vmem:[%s918_s6] ss:$0 sm:$0xff]  ;;  %p740_p4 = scmp.ne.s32.totalorder %s502_s10, %s739_s4  ;;  %p745_p6 = scmp.lt.s32.totalorder %s739_s4, %s739_s4 }
  0x58   :  { %161 = vmatpush1.bf16.msra.mxu0 %v625_v10  ;;  %557 = vmatprep.subr.bf16.mxu1 %v633_v16 }
  0x59   :  { %582 = vmatprep.subr.bf16.mxu0 %v778_v27  ;;  %p746_p7 = por %p745_p6, %p744_p5 }
  0x5b   :  { %524 = vmatmul.mubr.msk.bf16.vlgmr.msra.gmra.mrb[0].mxu0 %vm150_vm0, %v626_v14  ;;  %558 = vmatpush3.bf16.msra.mxu1 %v634_v17  ;;  %p747_p8 = pnand %p746_p7, %p740_p4 }
  0x5c   :  { %559 = vmatprep.subr.bf16.mxu1 %v635_v18  ;;  %583 = vmatpush3.bf16.msra.mxu0 %v643_v26 }
  0x5d   :  { %584 = vmatprep.subr.bf16.mxu0 %v778_v27  ;;  %598 = vmatprep.mubr.msk.bf16.mxu0 %vm779_vm1, %v778_v27 }
  0x5f   :  { %560 = vmatpush3.bf16.msra.mxu1 %v636_v19 }
  0x60   :  { %561 = vmatprep.subr.bf16.mxu1 %v637_v20  ;;  %585 = vmatpush3.bf16.msra.mxu0 %v644_v28 }
  0x61   :  { %586 = vmatprep.subr.bf16.mxu0 %v778_v27 }
  0x63   :  { %562 = vmatpush3.bf16.msra.mxu1 %v638_v21 }
  0x64   :  { %563 = vmatprep.subr.bf16.mxu1 %v639_v22  ;;  %587 = vmatpush3.bf16.msra.mxu0 %v645_v29 }
  0x65   :  { %588 = vmatprep.subr.bf16.mxu0 %v778_v27 }
  0x67   :  { %564 = vmatpush3.bf16.msra.mxu1 %v640_v23 }
  0x68   :  { %565 = vmatprep.subr.bf16.mxu1 %v641_v24  ;;  %589 = vmatpush3.bf16.msra.mxu0 %v646_v30 }
  0x69   :  { %590 = vmatprep.subr.bf16.mxu0 %v778_v27 }
  0x6b   :  { %566 = vmatpush3.bf16.msra.mxu1 %v642_v25 }
  0x6c   :  { %591 = vmatpush3.bf16.msra.mxu0 %v647_v31 }
  0x6d   :  { %592 = vmatprep.subr.bf16.mxu0 %v778_v27 }
  0x70   :  { %593 = vmatpush3.bf16.msra.mxu0 %v648_v53 }
  0x71   :  { %594 = vmatprep.subr.bf16.mxu0 %v778_v27 }
  0x74   :  { %595 = vmatpush3.bf16.msra.mxu0 %v649_v54 }
  0x75   :  { %596 = vmatprep.subr.bf16.mxu0 %v778_v27 }
  0x78   :  { %597 = vmatpush3.bf16.msra.mxu0 %v650_v55 }
 0x12e   :  { %v188_v39 = vpop.f32.mrb[0].mxu0 }
 0x12f   :  { %v189_v40 = vadd.f32 %v188_v39, %v98_v37  ;;  %v190_v41 = vpop.f32.mrb[1].mxu0 }
 0x130   :  { %v191_v42 = vadd.f32 %v190_v41, %v102_v38  ;;  %v192_v43 = vpop.f32.mrb[2].mxu0 }
 0x131   :  { %v193_v44 = vadd.f32 %v192_v43, %v98_v37  ;;  %v194_v45 = vpop.f32.mrb[3].mxu0  ;;  %v197_v47 = vmax.f32 %v189_v40, 0.0 }
 0x132   :  { %v195_v46 = vadd.f32 %v194_v45, %v102_v38  ;;  %v198_v49 = vmax.f32 %v191_v42, 0.0 }
 0x133   :  { %v199_v48 = vmax.f32 %v193_v44, 0.0 }
 0x134   :  { %v200_v50 = vmax.f32 %v195_v46, 0.0 }
 0x135   :  { %v201_v51 = vpack.c.bf16 %v199_v48, %v197_v47 }
 0x136   :  { %v202_v52 = vpack.c.bf16 %v200_v50, %v198_v49 }
 0x138   :  { %370 = vmatprep.mubr.bf16.mxu1 %v202_v52 }
 0x139   :  { %371 = vmatmul.mubr.bf16.vlgmr.msra.gmra.mrb[0].mxu1 %v201_v51 }
 0x20c   :  { %v567_v56 = vpop.f32.mrb[0].mxu1 }
 0x20d   :  { %v568_v58 = vpop.f32.mrb[1].mxu1 }
 0x20e   :  { %v569_v59 = vadd.f32 %v568_v58, %v567_v56  ;;  %v570_v60 = vpop.f32.mrb[2].mxu1 }
 0x20f   :  { %v571_v61 = vpop.f32.mrb[3].mxu1 }
 0x210   :  { %v373_v62 = vadd.f32 %v569_v59, %v525_v57  ;;  %v572_v63 = vadd.f32 %v571_v61, %v570_v60 }
 0x212   :  { %v376_v0 = vadd.f32 %v572_v63, %v525_v57  ;;  %v379_v1 = vmax.f32 %v373_v62, 0.0 }
 0x214   :  { %v380_v2 = vmax.f32 %v376_v0, 0.0 }
 0x216   :  { %v381_v3 = vpack.c.bf16 %v380_v2, %v379_v1 }
 0x218   :  { %599 = vmatmul.mubr.bf16.vlgmr.msra.gmra.mrb[4].mxu0 %v381_v3 }
 0x2eb   :  { %v487_v5 = vpop.f32.mrb[4].mxu0 }
 0x2ec   :  { %v488_v6 = vadd.f32 %v542_v4, %v487_v5  ;;  %v600_v7 = vpop.f32.mrb[5].mxu0 }
 0x2ed   :  { %v490_v8 = vpop.f32.mrb[6].mxu0 }
 0x2ee   :  { %494 = vst [vmem:[#allocation10] sm:$0xff] %v488_v6  ;;  %v491_v9 = vadd.f32 %v542_v4, %v490_v8  ;;  %v601_v10 = vpop.f32.mrb[7].mxu0 }
 0x2f0   :  { %495 = vst [vmem:[#allocation10 + $0x8] sm:$0xff] %v491_v9 }
 0x2f1   :  { %750 = shalt.err (!%p747_p8)
}
 0x2f2   :  { %s751_s14 = scalar_lea.hbm %s919_s7, 256 }
 0x2f3   :  { %p752_p9 = scmp.ne.s32.totalorder %s919_s7, %s751_s14  ;;  %p755_p10 = scmp.lt.u32.totalorder %s751_s14, %s919_s7 }
 0x2f5   :  { %p757_p11 = pnand %p755_p10, %p752_p9 }
 0x2f7   :  { %760 = shalt.err (!%p757_p11)
}
 0x2f8   :  { %507 = dma.vmem_to_hbm [thread:$0]  %s502_s10, 256, %s919_s7, [#allocation4], %s770_s11, %s770_s11, %s771_s12  }
 0x2f9   :  { %767 = dma.done.wait [#allocation4], 256  }
 0x2fa   :  { %768 = vsyncadd [#allocation4], 4294967040 }
 0x2fb   :  { %511 = vsyncpa [#allocation3], 1 }
 0x2fc   :  { %512 = vsyncpa [#allocation6], 1 }
 0x2fd   :  { %513 = vsyncpa [#allocation9], 1 }
 0x2fe   :  { %514 = vsyncpa [#allocation4], 1 }

</bundles_post_ra>
